<compile_context>
chip_gen: v7x
topology: tpu7x:2x2x1
jax: 0.10.0
libtpu: 0.0.40
codegen_flags: <defaults>
</compile_context>

<pallas_src>
import math
from functools import partial

import jax
import jax.numpy as jnp
from jax.experimental import pallas as pl
from jax.experimental.pallas import tpu as pltpu


def _round_up(x, m):
    return (x + m - 1) // m * m


def qnet_kernel(x_ref, w1_ref, b1_ref, w2_ref, b2_ref, w3_ref, b3_ref,
                w4_ref, b4_ref, o_ref):
    # bf16 operands on the MXU, f32 accumulation; bias-add + ReLU in f32 on the
    # VPU (portable to v5e, and the VPU is not the binding slot here).
    x = x_ref[...].astype(jnp.bfloat16)
    h = jnp.dot(x, w1_ref[...], preferred_element_type=jnp.float32)
    h = jnp.maximum(h + b1_ref[...], 0.0)
    h = jnp.dot(h.astype(jnp.bfloat16), w2_ref[...],
                preferred_element_type=jnp.float32)
    h = jnp.maximum(h + b2_ref[...], 0.0)
    h = jnp.dot(h.astype(jnp.bfloat16), w3_ref[...],
                preferred_element_type=jnp.float32)
    h = jnp.maximum(h + b3_ref[...], 0.0)
    h = jnp.dot(h.astype(jnp.bfloat16), w4_ref[...],
                preferred_element_type=jnp.float32)
    o_ref[...] = (h + b4_ref[...]).astype(o_ref.dtype)


def _choose_tiling(B, tile_b):
    """Pick (tile, padded_batch). tile is a multiple of 8, at most tile_b, and
    chosen so the grid has >=2 steps when the batch allows it (v7x megacore),
    while keeping steps large (v5e/v6e) and last-step padding small."""
    b8 = _round_up(max(B, 1), 8)
    tile_b = max(8, _round_up(tile_b, 8))
    half = _round_up(pl.cdiv(b8, 2), 8)          # aim for >= 2 grid steps
    tile = min(tile_b, half)
    nsteps = pl.cdiv(b8, tile)
    tile = _round_up(pl.cdiv(b8, nsteps), 8)     # minimize padded rows
    return tile, nsteps * tile


def prepare_qnet_params(params):
    """One-time prep (per parameter update, NOT per forward call):
    bf16 weights for the MXU, f32 biases shaped (1, out)."""
    prepped = {}
    for i in range(1, 5):
        prepped[f"w{i}"] = params[f"w{i}"].astype(jnp.bfloat16)
        prepped[f"b{i}"] = params[f"b{i}"].astype(jnp.float32)
    return prepped


@partial(jax.jit, static_argnames=("tile_b",))
def qnet_forward(state, prepped, *, tile_b=512):
    """state: (B, 2n+2) float32. prepped: output of prepare_qnet_params."""
    B, in_dim = state.shape
    out_dim = prepped["w4"].shape[1]

    tile, b_pad = _choose_tiling(B, tile_b)
    x = state if b_pad == B else jnp.pad(state, ((0, b_pad - B), (0, 0)))

    def resident(arr):
        # Full-array block, constant index -> stays in VMEM across grid steps.
        return pl.BlockSpec(arr.shape, lambda i: (0, 0))

    out = pl.pallas_call(
        qnet_kernel,
        out_shape=jax.ShapeDtypeStruct((b_pad, out_dim), jnp.float32),
        grid=(b_pad // tile,),
        in_specs=[
            # x streamed per batch-block; true last dim (= full array dim) is
            # legal even when 2n+2 < 128, and avoids a separate pad/cast pass.
            pl.BlockSpec((tile, in_dim), lambda i: (i, 0)),
            resident(prepped["w1"]), resident(prepped["b1"]),
            resident(prepped["w2"]), resident(prepped["b2"]),
            resident(prepped["w3"]), resident(prepped["b3"]),
            resident(prepped["w4"]), resident(prepped["b4"]),
        ],
        # Unpadded output block: full last dim (= out_dim) -> 8x less HBM
        # writeback than padding 2^n up to 128 when n is small.
        out_specs=pl.BlockSpec((tile, out_dim), lambda i: (i, 0)),
        compiler_params=pltpu.CompilerParams(
            dimension_semantics=("parallel",)),   # shard batch across TCs on v7x
    )(x, prepped["w1"], prepped["b1"], prepped["w2"], prepped["b2"],
      prepped["w3"], prepped["b3"], prepped["w4"], prepped["b4"])

    return out if b_pad == B else out[:B]


def init_qnet_params(key, n):
    """Deterministic init mimicking torch.nn.Linear defaults:
    U(-1/sqrt(fan_in), 1/sqrt(fan_in)) for weight and bias.
    Weights are returned already transposed to (in, out); stored in f32."""
    dims = [(2 * n + 2, 128), (128, 256), (256, 256), (256, 2 ** n)]
    params = {}
    for i, (fan_in, fan_out) in enumerate(dims, start=1):
        key, kw, kb = jax.random.split(key, 3)
        bound = 1.0 / math.sqrt(fan_in)
        params[f"w{i}"] = jax.random.uniform(
            kw, (fan_in, fan_out), jnp.float32, minval=-bound, maxval=bound)
        params[f"b{i}"] = jax.random.uniform(
            kb, (1, fan_out), jnp.float32, minval=-bound, maxval=bound)
    return params


def qnet_reference(state, params):
    """Pure-JAX reference with matching numerics (bf16 operands, f32 accumulate)."""
    def layer(x, w, b, relu):
        h = jnp.dot(x.astype(jnp.bfloat16), w.astype(jnp.bfloat16),
                    preferred_element_type=jnp.float32) + b
        return jnp.maximum(h, 0.0) if relu else h
    h = layer(state, params["w1"], params["b1"], True)
    h = layer(h, params["w2"], params["b2"], True)
    h = layer(h, params["w3"], params["b3"], True)
    return layer(h, params["w4"], params["b4"], False)


if __name__ == "__main__":
    n = 4                        # input dim = 2n+2 = 10, output dim = 2^n = 16
    key = jax.random.PRNGKey(0)
    key, kx1, kx2 = jax.random.split(key, 3)
    params = init_qnet_params(key, n)
    prepped = prepare_qnet_params(params)   # one-time weight prep (cached)

    # Case 1: small batch, divides evenly -> 2 grid steps of 32 rows.
    state1 = jax.random.normal(kx1, (64, 2 * n + 2), jnp.float32)
    out1 = jax.block_until_ready(qnet_forward(state1, prepped))
    ref1 = qnet_reference(state1, params)
    assert out1.shape == (64, 2 ** n), out1.shape
    assert jnp.allclose(out1, ref1, atol=2e-2, rtol=2e-2), \
        float(jnp.max(jnp.abs(out1 - ref1)))

    # Case 2: ragged batch -> exercises the row-padding path.
    state2 = jax.random.normal(kx2, (37, 2 * n + 2), jnp.float32)
    out2 = jax.block_until_ready(qnet_forward(state2, prepped))
    ref2 = qnet_reference(state2, params)
    assert out2.shape == (37, 2 ** n), out2.shape
    assert jnp.allclose(out2, ref2, atol=2e-2, rtol=2e-2), \
        float(jnp.max(jnp.abs(out2 - ref2)))

    print("KERNEL_OK")
</pallas_src>

<mosaic_0001>
module attributes {stable_mosaic.version = 11 : i64} {
  func.func @qnet_kernel(%arg0: i32, %arg1: memref<32x10xf32, #tpu.memory_space<vmem>>, %arg2: memref<10x128xbf16, #tpu.memory_space<vmem>>, %arg3: memref<1x128xf32, #tpu.memory_space<vmem>>, %arg4: memref<128x256xbf16, #tpu.memory_space<vmem>>, %arg5: memref<1x256xf32, #tpu.memory_space<vmem>>, %arg6: memref<256x256xbf16, #tpu.memory_space<vmem>>, %arg7: memref<1x256xf32, #tpu.memory_space<vmem>>, %arg8: memref<256x16xbf16, #tpu.memory_space<vmem>>, %arg9: memref<1x16xf32, #tpu.memory_space<vmem>>, %arg10: memref<32x16xf32, #tpu.memory_space<vmem>>) attributes {dimension_semantics = [#tpu.dimension_semantics<parallel>], iteration_bounds = array<i64: 2>, scalar_prefetch = 0 : i64, scratch_operands = 0 : i64, tpu.core_type = #tpu.core_type<tc>, window_params = [{transform_indices = @transform_0, window_bounds = array<i64: 32, 10>}, {pipeline_mode = #tpu.pipeline_mode<synchronous>, transform_indices = @transform_1, window_bounds = array<i64: 10, 128>}, {pipeline_mode = #tpu.pipeline_mode<synchronous>, transform_indices = @transform_2, window_bounds = array<i64: 1, 128>}, {pipeline_mode = #tpu.pipeline_mode<synchronous>, transform_indices = @transform_3, window_bounds = array<i64: 128, 256>}, {pipeline_mode = #tpu.pipeline_mode<synchronous>, transform_indices = @transform_4, window_bounds = array<i64: 1, 256>}, {pipeline_mode = #tpu.pipeline_mode<synchronous>, transform_indices = @transform_5, window_bounds = array<i64: 256, 256>}, {pipeline_mode = #tpu.pipeline_mode<synchronous>, transform_indices = @transform_6, window_bounds = array<i64: 1, 256>}, {pipeline_mode = #tpu.pipeline_mode<synchronous>, transform_indices = @transform_7, window_bounds = array<i64: 256, 16>}, {pipeline_mode = #tpu.pipeline_mode<synchronous>, transform_indices = @transform_8, window_bounds = array<i64: 1, 16>}, {transform_indices = @transform_9, window_bounds = array<i64: 32, 16>}]} {
    %c0 = arith.constant 0 : index
    %c0_0 = arith.constant 0 : index
    %0 = vector.load %arg1[%c0, %c0_0] : memref<32x10xf32, #tpu.memory_space<vmem>>, vector<32x10xf32>
    %1 = arith.truncf %0 : vector<32x10xf32> to vector<32x10xbf16>
    %c0_1 = arith.constant 0 : index
    %c0_2 = arith.constant 0 : index
    %2 = vector.load %arg2[%c0_1, %c0_2] : memref<10x128xbf16, #tpu.memory_space<vmem>>, vector<10x128xbf16>
    %cst = arith.constant dense<0.000000e+00> : vector<32x128xf32>
    %3 = tpu.matmul %1, %2, %cst {dimension_numbers = #tpu.dot_dimension_numbers<[1], [0], [0], [1], [0, 0, 1, 1], [], []>} : vector<32x10xbf16>, vector<10x128xbf16>, vector<32x128xf32> -> vector<32x128xf32>
    %c0_3 = arith.constant 0 : index
    %c0_4 = arith.constant 0 : index
    %4 = vector.load %arg3[%c0_3, %c0_4] : memref<1x128xf32, #tpu.memory_space<vmem>>, vector<1x128xf32>
    %5 = vector.broadcast %4 : vector<1x128xf32> to vector<32x128xf32>
    %6 = arith.addf %3, %5 : vector<32x128xf32>
    %cst_5 = arith.constant 0.000000e+00 : f32
    %7 = vector.broadcast %cst_5 : f32 to vector<32x128xf32>
    %8 = arith.maximumf %6, %7 : vector<32x128xf32>
    %9 = arith.truncf %8 : vector<32x128xf32> to vector<32x128xbf16>
    %c0_6 = arith.constant 0 : index
    %c0_7 = arith.constant 0 : index
    %10 = vector.load %arg4[%c0_6, %c0_7] : memref<128x256xbf16, #tpu.memory_space<vmem>>, vector<128x256xbf16>
    %cst_8 = arith.constant dense<0.000000e+00> : vector<32x256xf32>
    %11 = tpu.matmul %9, %10, %cst_8 {dimension_numbers = #tpu.dot_dimension_numbers<[1], [0], [0], [1], [0, 0, 1, 1], [], []>} : vector<32x128xbf16>, vector<128x256xbf16>, vector<32x256xf32> -> vector<32x256xf32>
    %c0_9 = arith.constant 0 : index
    %c0_10 = arith.constant 0 : index
    %12 = vector.load %arg5[%c0_9, %c0_10] : memref<1x256xf32, #tpu.memory_space<vmem>>, vector<1x256xf32>
    %13 = vector.broadcast %12 : vector<1x256xf32> to vector<32x256xf32>
    %14 = arith.addf %11, %13 : vector<32x256xf32>
    %cst_11 = arith.constant 0.000000e+00 : f32
    %15 = vector.broadcast %cst_11 : f32 to vector<32x256xf32>
    %16 = arith.maximumf %14, %15 : vector<32x256xf32>
    %17 = arith.truncf %16 : vector<32x256xf32> to vector<32x256xbf16>
    %c0_12 = arith.constant 0 : index
    %c0_13 = arith.constant 0 : index
    %18 = vector.load %arg6[%c0_12, %c0_13] : memref<256x256xbf16, #tpu.memory_space<vmem>>, vector<256x256xbf16>
    %cst_14 = arith.constant dense<0.000000e+00> : vector<32x256xf32>
    %19 = tpu.matmul %17, %18, %cst_14 {dimension_numbers = #tpu.dot_dimension_numbers<[1], [0], [0], [1], [0, 0, 1, 1], [], []>} : vector<32x256xbf16>, vector<256x256xbf16>, vector<32x256xf32> -> vector<32x256xf32>
    %c0_15 = arith.constant 0 : index
    %c0_16 = arith.constant 0 : index
    %20 = vector.load %arg7[%c0_15, %c0_16] : memref<1x256xf32, #tpu.memory_space<vmem>>, vector<1x256xf32>
    %21 = vector.broadcast %20 : vector<1x256xf32> to vector<32x256xf32>
    %22 = arith.addf %19, %21 : vector<32x256xf32>
    %cst_17 = arith.constant 0.000000e+00 : f32
    %23 = vector.broadcast %cst_17 : f32 to vector<32x256xf32>
    %24 = arith.maximumf %22, %23 : vector<32x256xf32>
    %25 = arith.truncf %24 : vector<32x256xf32> to vector<32x256xbf16>
    %c0_18 = arith.constant 0 : index
    %c0_19 = arith.constant 0 : index
    %26 = vector.load %arg8[%c0_18, %c0_19] : memref<256x16xbf16, #tpu.memory_space<vmem>>, vector<256x16xbf16>
    %cst_20 = arith.constant dense<0.000000e+00> : vector<32x16xf32>
    %27 = tpu.matmul %25, %26, %cst_20 {dimension_numbers = #tpu.dot_dimension_numbers<[1], [0], [0], [1], [0, 0, 1, 1], [], []>} : vector<32x256xbf16>, vector<256x16xbf16>, vector<32x16xf32> -> vector<32x16xf32>
    %c0_21 = arith.constant 0 : index
    %c0_22 = arith.constant 0 : index
    %28 = vector.load %arg9[%c0_21, %c0_22] : memref<1x16xf32, #tpu.memory_space<vmem>>, vector<1x16xf32>
    %29 = vector.broadcast %28 : vector<1x16xf32> to vector<32x16xf32>
    %30 = arith.addf %27, %29 : vector<32x16xf32>
    %c0_23 = arith.constant 0 : index
    %c0_24 = arith.constant 0 : index
    %31 = vector.load %arg10[%c0_23, %c0_24] : memref<32x16xf32, #tpu.memory_space<vmem>>, vector<32x16xf32>
    tpu.vector_store %arg10[%c0_23, %c0_24], %30 {strides = array<i32>} : memref<32x16xf32, #tpu.memory_space<vmem>>, vector<32x16xf32>,
    return
  }
  func.func @transform_0(%arg0: i32) -> (i32, i32) {
    %c0_i32 = arith.constant 0 : i32
    %c0_i32_0 = arith.constant 0 : i32
    return %arg0, %c0_i32 : i32, i32
  }
  func.func @transform_1(%arg0: i32) -> (i32, i32) {
    %c0_i32 = arith.constant 0 : i32
    %c0_i32_0 = arith.constant 0 : i32
    %c0_i32_1 = arith.constant 0 : i32
    return %c0_i32, %c0_i32_0 : i32, i32
  }
  func.func @transform_2(%arg0: i32) -> (i32, i32) {
    %c0_i32 = arith.constant 0 : i32
    %c0_i32_0 = arith.constant 0 : i32
    %c0_i32_1 = arith.constant 0 : i32
    return %c0_i32, %c0_i32_0 : i32, i32
  }
  func.func @transform_3(%arg0: i32) -> (i32, i32) {
    %c0_i32 = arith.constant 0 : i32
    %c0_i32_0 = arith.constant 0 : i32
    %c0_i32_1 = arith.constant 0 : i32
    return %c0_i32, %c0_i32_0 : i32, i32
  }
  func.func @transform_4(%arg0: i32) -> (i32, i32) {
    %c0_i32 = arith.constant 0 : i32
    %c0_i32_0 = arith.constant 0 : i32
    %c0_i32_1 = arith.constant 0 : i32
    return %c0_i32, %c0_i32_0 : i32, i32
  }
  func.func @transform_5(%arg0: i32) -> (i32, i32) {
    %c0_i32 = arith.constant 0 : i32
    %c0_i32_0 = arith.constant 0 : i32
    %c0_i32_1 = arith.constant 0 : i32
    return %c0_i32, %c0_i32_0 : i32, i32
  }
  func.func @transform_6(%arg0: i32) -> (i32, i32) {
    %c0_i32 = arith.constant 0 : i32
    %c0_i32_0 = arith.constant 0 : i32
    %c0_i32_1 = arith.constant 0 : i32
    return %c0_i32, %c0_i32_0 : i32, i32
  }
  func.func @transform_7(%arg0: i32) -> (i32, i32) {
    %c0_i32 = arith.constant 0 : i32
    %c0_i32_0 = arith.constant 0 : i32
    %c0_i32_1 = arith.constant 0 : i32
    return %c0_i32, %c0_i32_0 : i32, i32
  }
  func.func @transform_8(%arg0: i32) -> (i32, i32) {
    %c0_i32 = arith.constant 0 : i32
    %c0_i32_0 = arith.constant 0 : i32
    %c0_i32_1 = arith.constant 0 : i32
    return %c0_i32, %c0_i32_0 : i32, i32
  }
  func.func @transform_9(%arg0: i32) -> (i32, i32) {
    %c0_i32 = arith.constant 0 : i32
    %c0_i32_0 = arith.constant 0 : i32
    return %arg0, %c0_i32 : i32, i32
  }
}

</mosaic_0001>

<bundles_post_ra>
// kernel: qnet_forward.1
= control target key start
LH: loop header
LB: loop body
LE: loop exit
PB: predicated region body
PF: predicated region fallthrough
CT: control target
= control target key end

     0   :  { %14 = vsyncpa [#allocation3], 0  ;;  %s1462_s30 = smov 0   ;;  %s1645_s0 = inlined_call_operand.vmem [shape: f32[64,10], index: 0, kind: input, shape index: {}]   ;;  %s1646_s1 = inlined_call_operand.vmem [shape: bf16[10,128], index: 1, kind: input, shape index: {}]   ;;  %s1647_s2 = inlined_call_operand.vmem [shape: f32[1,128], index: 2, kind: input, shape index: {}]   ;;  %s1648_s3 = inlined_call_operand.vmem [shape: bf16[128,256], index: 3, kind: input, shape index: {}]   ;;  %s1649_s4 = inlined_call_operand.vmem [shape: f32[1,256], index: 4, kind: input, shape index: {}]   ;;  %s1650_s5 = inlined_call_operand.hbm [shape: bf16[256,256], index: 5, kind: input, shape index: {}]   ;;  %s1651_s6 = inlined_call_operand.vmem [shape: f32[1,256], index: 6, kind: input, shape index: {}]   ;;  %s1652_s7 = inlined_call_operand.vmem [shape: bf16[256,16], index: 7, kind: input, shape index: {}]   ;;  %s1653_s8 = inlined_call_operand.vmem [shape: f32[1,16], index: 8, kind: input, shape index: {}]   ;;  %s1654_s9 = inlined_call_operand.vmem [shape: f32[64,16], index: 9, kind: output, shape index: {}]  }
   0x1 LB: > { %s1137_s10 = sadd.s32 4294967295, %s1406_s30   ;;  %p1139_p0 = scmp.ge.s32.totalorder %s1406_s30, 1  ;;  %s1406_s30 = sphi %s1462_s30, %s20_s30  }
   0x2   : > { %p245_p1 = scmp.lt.s32.totalorder %s1406_s30, 3  ;;  %s1408_s11 = smov [#allocation2]  }
   0x3   : > { %s269_s12 = sshll.u32 %s1408_s11, 4  ;;  %p1476_p3 = scmp.eq.s32.totalorder %s1137_s10, 0  ;;  %s270_s12 = int_to_ptr.vmem [resolvable:$true] %s269_s12 }
   0x4   : > { %p1470_p2 = pnand %p1139_p0, %p245_p1  ;;  %s1368_s18 = scalar_lea.hbm %s1650_s5, 4096 }
   0x5   : > { %s1659_s14 = scalar_select %p1476_p3, 1, 0 }
   0x6   : > { %s1658_s13 = scalar_select %p1470_p2, 1, 0 }
   0x7   : > { %p1261_p4 = pneg %p1470_p2  ;;  %p1369_p6 = scmp.ne.s32.totalorder %s1650_s5, %s1368_s18 }
   0x8   : > { %p1375_p10 = scmp.lt.u32.totalorder %s1368_s18, %s1650_s5 }
   0x9   : > { %p1484_p5 = pnand %p1476_p3, %p1261_p4 }
   0xb   : > { %p1370_p7 = pneg %p1484_p5 }
   0xd   : > { %p1371_p8 = pnand %p1370_p7, %p1369_p6 }
   0xf   : > { %p1372_p9 = pneg %p1371_p8 }
  0x11   : > { %p1377_p11 = pnand %p1375_p10, %p1372_p9 }
  0x13   : > { %1380 = shalt.err (!%p1377_p11)
}
  0x14   : > { %s1381_s23 = scalar_lea.vmem %s270_s12, 4096  ;;  %p1389_p1 = scmp.lt.s32.totalorder %s270_s12, %s270_s12 }
  0x15   : > { %p1382_p12 = scmp.ne.s32.totalorder %s270_s12, %s1381_s23  ;;  %p1390_p4 = scmp.lt.s32.totalorder %s1381_s23, %s1381_s23 }
  0x17   : > { %p1384_p13 = pnand %p1382_p12, %p1370_p7  ;;  %p1391_p3 = por %p1390_p4, %p1389_p1 }
  0x19   : > { %p1385_p0 = pneg %p1384_p13 }
  0x1b   : > { %p1392_p2 = pnand %p1391_p3, %p1385_p0 }
  0x1d   : > { %1395 = shalt.err (!%p1392_p2)
}
  0x1e   : > { %s1409_s24 = smov 128   ;;  %s1410_s25 = smov 8  }
  0x1f   : > { %1264 = dma.hbm_to_vmem [thread:$0]  (!%p1484_p5), %s1650_s5, 4096, %s270_s12, [#allocation3], %s1409_s24, %s1409_s24, %s1410_s25  }
  0x20   : > { %p1661_p6 = scmp.ne.s32.totalorder %s1658_s13, 0 }
  0x21   : > { %p1662_p8 = scmp.ne.s32.totalorder (!%p1661_p6), %s1659_s14, 0 }
  0x22   : > { %303 = sbr.rel (%p1661_p6) target bundleno = 945 (0x3b1), region = 56 }
  0x29   : > { %1401 = dma.done.wait (%p1662_p8), [#allocation3], 4096  }
  0x2a   : > { %1403 = vsyncadd (%p1662_p8), [#allocation3], 4294963200  ;;  %s1144_s28 = sshll.u32 %s1137_s10, 2  ;;  %vm379_vm0 = vcmask 1044480   ;;  %v1279_v0 = vld [vmem:[%s1646_s1] sm:$0x1f]  }
  0x2b   : > { %p340_p2 = scmp.lt.s32.totalorder %s1144_s28, 7  ;;  %vm372_vm1 = vcmask 80896   ;;  %1256 = vmatprep.subr.msk.bf16.mxu0 %vm379_vm0, %v1279_v0  ;;  %v381_v4 = vsel %vm379_vm0, %v1279_v0, 0  ;;  %v1280_v8 = vld [vmem:[%s1648_s3 + $0x4] ss:$8 sps:$4 sm:$0xff]   ;;  %v1411_v24 = vmov 0  }
  0x2c   : > { %1251 = vmatpush3.bf16.msra.mxu0 %v381_v4  ;;  %v1282_v9 = vld [vmem:[%s1648_s3] ss:$8 sps:$4 sm:$0xff]   ;;  %v1283_v10 = vld [vmem:[%s1648_s3 + $0x14] ss:$8 sps:$4 sm:$0xff]   ;;  %546 = vmatprep.subr.bf16.mxu1 %v1280_v8  ;;  %v1285_v11 = vld [vmem:[%s1648_s3 + $0x10] ss:$8 sps:$4 sm:$0xff]  }
  0x2d   : > { %s1664_s28 = smov (!%p340_p2, %s1144_s28), 7  ;;  %547 = vmatpush1.bf16.msra.mxu1 %v1282_v9  ;;  %v1286_v12 = vld [vmem:[%s1648_s3 + $0x24] ss:$8 sps:$4 sm:$0xff]   ;;  %v1288_v13 = vld [vmem:[%s1648_s3 + $0x20] ss:$8 sps:$4 sm:$0xff]   ;;  %578 = vmatprep.mubr.bf16.mxu1 %v1411_v24  ;;  %vm1064_vm2 = vcmask 130048  }
  0x2e   : > { %s1145_s29 = sshll.u32 %s1664_s28, 3  ;;  %548 = vmatprep.subr.bf16.mxu1 %v1283_v10  ;;  %v1289_v14 = vld [vmem:[%s1648_s3 + $0x34] ss:$8 sps:$4 sm:$0xff]   ;;  %v1291_v15 = vld [vmem:[%s1648_s3 + $0x30] ss:$8 sps:$4 sm:$0xff]   ;;  %v1352_v8 = vld [vmem:[%s1652_s7 + $0x40] sm:$0xff]  }
  0x2f   : > { %s343_s13 = scalar_lea.vmem %s1645_s0, %s1145_s29  ;;  %v1292_v16 = vld [vmem:[%s1648_s3 + $0x44] ss:$8 sps:$4 sm:$0xff]   ;;  %v1294_v17 = vld [vmem:[%s1648_s3 + $0x40] ss:$8 sps:$4 sm:$0xff]   ;;  %v1295_v18 = vld [vmem:[%s1648_s3 + $0x54] ss:$8 sps:$4 sm:$0xff]   ;;  %s349_s17 = scalar_lea.vmem %s1654_s9, %s1145_s29 }
  0x30   : > { %v352_v1 = vld [vmem:[%s343_s13] sm:$0xff]  ;;  %v353_v2 = vld [vmem:[%s343_s13 + $0x8] sm:$0xff]  ;;  %v354_v3 = vld [vmem:[%s343_s13 + $0x10] sm:$0xff] }
  0x31   : > { %v356_v5 = vpack.c.bf16 %v353_v2, %v352_v1  ;;  %v355_v6 = vld [vmem:[%s343_s13 + $0x18] sm:$0xff]  ;;  %549 = vmatpush1.bf16.msra.mxu1 %v1285_v11  ;;  %v1298_v20 = vld [vmem:[%s1648_s3 + $0x64] ss:$8 sps:$4 sm:$0xff]   ;;  %v1300_v21 = vld [vmem:[%s1648_s3 + $0x60] ss:$8 sps:$4 sm:$0xff]  }
  0x32   : > { %v357_v7 = vpack.c.bf16 %v355_v6, %v354_v3  ;;  %550 = vmatprep.subr.bf16.mxu1 %v1286_v12  ;;  %v1297_v19 = vld [vmem:[%s1648_s3 + $0x50] ss:$8 sps:$4 sm:$0xff]   ;;  %v1301_v22 = vld [vmem:[%s1648_s3 + $0x74] ss:$8 sps:$4 sm:$0xff]   ;;  %v1304_v25 = vld [vmem:[#allocation2] ss:$8 sps:$4 sm:$0xff]  }
  0x33   : > { %1252 = vmatprep.mubr.msk.bf16.mxu0 %vm372_vm1, %v356_v5  ;;  %v1303_v23 = vld [vmem:[%s1648_s3 + $0x70] ss:$8 sps:$4 sm:$0xff]   ;;  %v1306_v26 = vld [vmem:[#allocation2 + $0x4] ss:$8 sps:$4 sm:$0xff]   ;;  %v1309_v27 = vld [vmem:[#allocation2 + $0x14] ss:$8 sps:$4 sm:$0xff]  }
  0x34   : > { %1253 = vmatmul.mubr.msk.bf16.vlgmr.msra.gmra.mrb[0].mxu0 %vm372_vm1, %v357_v7  ;;  %815 = vmatprep.subr.bf16.mxu0 %v1306_v26  ;;  %v1307_v28 = vld [vmem:[#allocation2 + $0x10] ss:$8 sps:$4 sm:$0xff]   ;;  %v1312_v29 = vld [vmem:[#allocation2 + $0x24] ss:$8 sps:$4 sm:$0xff]   ;;  %v1310_v30 = vld [vmem:[#allocation2 + $0x20] ss:$8 sps:$4 sm:$0xff]  }
  0x35   : > { %551 = vmatpush1.bf16.msra.mxu1 %v1288_v13  ;;  %816 = vmatpush1.bf16.msra.mxu0 %v1304_v25  ;;  %v1315_v31 = vld [vmem:[#allocation2 + $0x34] ss:$8 sps:$4 sm:$0xff]   ;;  %v1313_v32 = vld [vmem:[#allocation2 + $0x30] ss:$8 sps:$4 sm:$0xff]   ;;  %v1318_v33 = vld [vmem:[#allocation2 + $0x44] ss:$8 sps:$4 sm:$0xff]  }
  0x36   : > { %552 = vmatprep.subr.bf16.mxu1 %v1289_v14  ;;  %817 = vmatprep.subr.bf16.mxu0 %v1309_v27  ;;  %v1316_v34 = vld [vmem:[#allocation2 + $0x40] ss:$8 sps:$4 sm:$0xff]   ;;  %v1321_v35 = vld [vmem:[#allocation2 + $0x54] ss:$8 sps:$4 sm:$0xff]   ;;  %v1319_v36 = vld [vmem:[#allocation2 + $0x50] ss:$8 sps:$4 sm:$0xff]  }
  0x37   : > { %v1324_v37 = vld [vmem:[#allocation2 + $0x64] ss:$8 sps:$4 sm:$0xff]   ;;  %v1322_v38 = vld [vmem:[#allocation2 + $0x60] ss:$8 sps:$4 sm:$0xff]   ;;  %v1327_v39 = vld [vmem:[#allocation2 + $0x74] ss:$8 sps:$4 sm:$0xff]  }
  0x38   : > { %v1325_v40 = vld [vmem:[#allocation2 + $0x70] ss:$8 sps:$4 sm:$0xff]   ;;  %v1330_v41 = vld [vmem:[#allocation2 + $0x84] ss:$8 sps:$4 sm:$0xff]   ;;  %v1328_v42 = vld [vmem:[#allocation2 + $0x80] ss:$8 sps:$4 sm:$0xff]  }
  0x39   : > { %553 = vmatpush1.bf16.msra.mxu1 %v1291_v15  ;;  %818 = vmatpush1.bf16.msra.mxu0 %v1307_v28  ;;  %v1333_v43 = vld [vmem:[#allocation2 + $0x94] ss:$8 sps:$4 sm:$0xff]   ;;  %v1331_v44 = vld [vmem:[#allocation2 + $0x90] ss:$8 sps:$4 sm:$0xff]   ;;  %v1336_v45 = vld [vmem:[#allocation2 + $0xa4] ss:$8 sps:$4 sm:$0xff]  }
  0x3a   : > { %554 = vmatprep.subr.bf16.mxu1 %v1292_v16  ;;  %819 = vmatprep.subr.bf16.mxu0 %v1312_v29  ;;  %v1334_v46 = vld [vmem:[#allocation2 + $0xa0] ss:$8 sps:$4 sm:$0xff]   ;;  %v1339_v47 = vld [vmem:[#allocation2 + $0xb4] ss:$8 sps:$4 sm:$0xff]   ;;  %v1337_v48 = vld [vmem:[#allocation2 + $0xb0] ss:$8 sps:$4 sm:$0xff]  }
  0x3b   : > { %v1342_v49 = vld [vmem:[#allocation2 + $0xc4] ss:$8 sps:$4 sm:$0xff]   ;;  %v1340_v50 = vld [vmem:[#allocation2 + $0xc0] ss:$8 sps:$4 sm:$0xff]   ;;  %v1345_v51 = vld [vmem:[#allocation2 + $0xd4] ss:$8 sps:$4 sm:$0xff]  }
  0x3c   : > { %v1343_v52 = vld [vmem:[#allocation2 + $0xd0] ss:$8 sps:$4 sm:$0xff]   ;;  %v1148_v53 = vld [vmem:[%s1647_s2] ss:$0 sm:$0xff]  ;;  %v1348_v4 = vld [vmem:[#allocation2 + $0xe4] ss:$8 sps:$4 sm:$0xff]  }
  0x3d   : > { %555 = vmatpush1.bf16.msra.mxu1 %v1294_v17  ;;  %820 = vmatpush1.bf16.msra.mxu0 %v1310_v30  ;;  %v1346_v5 = vld [vmem:[#allocation2 + $0xe0] ss:$8 sps:$4 sm:$0xff]   ;;  %v1351_v6 = vld [vmem:[#allocation2 + $0xf4] ss:$8 sps:$4 sm:$0xff]   ;;  %v1349_v7 = vld [vmem:[#allocation2 + $0xf0] ss:$8 sps:$4 sm:$0xff]  }
  0x3e   : > { %556 = vmatprep.subr.bf16.mxu1 %v1295_v18  ;;  %821 = vmatprep.subr.bf16.mxu0 %v1315_v31  ;;  %v1353_v9 = vld [vmem:[%s1652_s7] sm:$0xff]   ;;  %v1354_v10 = vld [vmem:[%s1652_s7 + $0x48] sm:$0xff]   ;;  %v1356_v12 = vld [vmem:[%s1652_s7 + $0x50] sm:$0xff]  }
  0x3f   : > { %v1355_v11 = vld [vmem:[%s1652_s7 + $0x8] sm:$0xff]   ;;  %v1357_v13 = vld [vmem:[%s1652_s7 + $0x10] sm:$0xff]   ;;  %v1358_v14 = vld [vmem:[%s1652_s7 + $0x58] sm:$0xff]  }
  0x40   : > { %v1359_v15 = vld [vmem:[%s1652_s7 + $0x18] sm:$0xff]   ;;  %v1360_v16 = vld [vmem:[%s1652_s7 + $0x60] sm:$0xff]   ;;  %v1362_v18 = vld [vmem:[%s1652_s7 + $0x68] sm:$0xff]  }
  0x41   : > { %557 = vmatpush1.bf16.msra.mxu1 %v1297_v19  ;;  %822 = vmatpush1.bf16.msra.mxu0 %v1313_v32  ;;  %v1361_v17 = vld [vmem:[%s1652_s7 + $0x20] sm:$0xff]   ;;  %v456_v19 = vlaneseq }
  0x42   : > { %558 = vmatprep.subr.bf16.mxu1 %v1298_v20  ;;  %823 = vmatprep.subr.bf16.mxu0 %v1318_v33 }
  0x43   : > { %v457_v20 = vshrl.u32 %v456_v19, 7 }
  0x45   : > { %559 = vmatpush1.bf16.msra.mxu1 %v1300_v21  ;;  %824 = vmatpush1.bf16.msra.mxu0 %v1316_v34  ;;  %v458_v21 = vsub.s32 0, %v457_v20 }
  0x46   : > { %560 = vmatprep.subr.bf16.mxu1 %v1301_v22  ;;  %825 = vmatprep.subr.bf16.mxu0 %v1321_v35  ;;  %v454_v22 = vld [vmem:[%s1649_s4] sm:$0x3] }
  0x49   : > { %561 = vmatpush1.bf16.msra.mxu1 %v1303_v23  ;;  %826 = vmatpush1.bf16.msra.mxu0 %v1319_v36  ;;  %v462_v23 = vsub.s32 1, %v457_v20 }
  0x4a   : > { %827 = vmatprep.subr.bf16.mxu0 %v1324_v37  ;;  %1222 = vmatprep.subr.bf16.mxu1 %v1352_v8 }
  0x4b   : > { %v463_v25 = vrot.slane %v454_v22, %v462_v23 }
  0x4d   : > { %828 = vmatpush1.bf16.msra.mxu0 %v1322_v38 }
  0x4e   : > { %829 = vmatprep.subr.bf16.mxu0 %v1327_v39 }
  0x51   : > { %830 = vmatpush1.bf16.msra.mxu0 %v1325_v40 }
  0x52   : > { %831 = vmatprep.subr.bf16.mxu0 %v1330_v41 }
  0x55   : > { %832 = vmatpush1.bf16.msra.mxu0 %v1328_v42 }
  0x56   : > { %833 = vmatprep.subr.bf16.mxu0 %v1333_v43 }
  0x59   : > { %834 = vmatpush1.bf16.msra.mxu0 %v1331_v44 }
  0x5a   : > { %835 = vmatprep.subr.bf16.mxu0 %v1336_v45 }
  0x5d   : > { %836 = vmatpush1.bf16.msra.mxu0 %v1334_v46 }
  0x5e   : > { %837 = vmatprep.subr.bf16.mxu0 %v1339_v47 }
  0x61   : > { %838 = vmatpush1.bf16.msra.mxu0 %v1337_v48 }
  0x62   : > { %839 = vmatprep.subr.bf16.mxu0 %v1342_v49 }
  0x65   : > { %840 = vmatpush1.bf16.msra.mxu0 %v1340_v50 }
  0x66   : > { %841 = vmatprep.subr.bf16.mxu0 %v1345_v51 }
  0x69   : > { %842 = vmatpush1.bf16.msra.mxu0 %v1343_v52 }
  0x6a   : > { %843 = vmatprep.subr.bf16.mxu0 %v1348_v4 }
  0x6d   : > { %844 = vmatpush1.bf16.msra.mxu0 %v1346_v5 }
  0x6e   : > { %845 = vmatprep.subr.bf16.mxu0 %v1351_v6 }
  0x71   : > { %846 = vmatpush1.bf16.msra.mxu0 %v1349_v7 }
 0x107   : > { %v1254_v54 = vpop.f32.mrb[0].mxu0 }
 0x108   : > { %v426_v55 = vadd.f32 %v1254_v54, %v1148_v53  ;;  %v417_v56 = vpop.f32.mrb[1].mxu0  ;;  %v1363_v54 = vld [vmem:[%s1652_s7 + $0x28] sm:$0xff]  }
 0x109   : > { %v418_v57 = vadd.f32 %v1148_v53, %v417_v56  ;;  %v1255_v58 = vpop.f32.mrb[2].mxu0  ;;  %v1365_v56 = vld [vmem:[%s1652_s7 + $0x30] sm:$0xff]  }
 0x10a   : > { %v429_v59 = vadd.f32 %v1255_v58, %v1148_v53  ;;  %v420_v60 = vpop.f32.mrb[3].mxu0  ;;  %v434_v62 = vmax.f32 %v426_v55, 0.0  ;;  %v1364_v55 = vld [vmem:[%s1652_s7 + $0x70] sm:$0xff]   ;;  %v1367_v58 = vld [vmem:[%s1652_s7 + $0x38] sm:$0xff]  }
 0x10b   : > { %v421_v61 = vadd.f32 %v1148_v53, %v420_v60  ;;  %v432_v0 = vmax.f32 %v418_v57, 0.0  ;;  %v1366_v57 = vld [vmem:[%s1652_s7 + $0x78] sm:$0xff]  }
 0x10c   : > { %v435_v63 = vmax.f32 %v429_v59, 0.0  ;;  %v643_v59 = vld [vmem:[%s1651_s6] sm:$0x3] }
 0x10d   : > { %v433_v1 = vmax.f32 %v421_v61, 0.0  ;;  %v648_v60 = vrot.slane %v643_v59, %v458_v21  ;;  %v652_v61 = vrot.slane %v643_v59, %v462_v23 }
 0x10e   : > { %v437_v2 = vpack.c.bf16 %v435_v63, %v434_v62 }
 0x10f   : > { %v436_v3 = vpack.c.bf16 %v433_v1, %v432_v0 }
 0x111   : > { %579 = vmatmul.mubr.bf16.vlgmr.msra.gmra.mrb[0].mxu1 %v436_v3 }
 0x112   : > { %588 = vmatprep.mubr.bf16.mxu1 %v1411_v24  ;;  %1223 = vmatpush3.bf16.msra.mxu1 %v1353_v9  ;;  %v459_v24 = vrot.slane %v454_v22, %v458_v21 }
 0x113   : > { %1224 = vmatprep.subr.bf16.mxu1 %v1354_v10 }
 0x116   : > { %1225 = vmatpush3.bf16.msra.mxu1 %v1355_v11 }
 0x117   : > { %1226 = vmatprep.subr.bf16.mxu1 %v1356_v12 }
 0x119   : > { %589 = vmatmul.mubr.bf16.gmra.mrb[4].mxu1 %v437_v2 }
 0x11a   : > { %1227 = vmatpush3.bf16.msra.mxu1 %v1357_v13 }
 0x11b   : > { %1228 = vmatprep.subr.bf16.mxu1 %v1358_v14 }
 0x11e   : > { %1229 = vmatpush3.bf16.msra.mxu1 %v1359_v15 }
 0x11f   : > { %1230 = vmatprep.subr.bf16.mxu1 %v1360_v16 }
 0x122   : > { %1231 = vmatpush3.bf16.msra.mxu1 %v1361_v17 }
 0x123   : > { %1232 = vmatprep.subr.bf16.mxu1 %v1362_v18 }
 0x126   : > { %1233 = vmatpush3.bf16.msra.mxu1 %v1363_v54 }
 0x127   : > { %1234 = vmatprep.subr.bf16.mxu1 %v1364_v55 }
 0x12a   : > { %1235 = vmatpush3.bf16.msra.mxu1 %v1365_v56 }
 0x12b   : > { %1236 = vmatprep.subr.bf16.mxu1 %v1366_v57 }
 0x12e   : > { %1237 = vmatpush3.bf16.msra.mxu1 %v1367_v58 }
 0x1e4   : > { %v580_v26 = vpop.f32.mrb[0].mxu1 }
 0x1e5   : > { %v581_v27 = vadd.f32 %v580_v26, %v459_v24  ;;  %v582_v28 = vpop.f32.mrb[1].mxu1 }
 0x1e6   : > { %v583_v29 = vadd.f32 %v582_v28, %v463_v25  ;;  %v584_v30 = vpop.f32.mrb[2].mxu1 }
 0x1e7   : > { %v585_v31 = vadd.f32 %v584_v30, %v459_v24  ;;  %v586_v32 = vpop.f32.mrb[3].mxu1  ;;  %v599_v34 = vmax.f32 %v581_v27, 0.0  ;;  %v1200_v27 = vld [vmem:[%s1653_s8] ss:$0 sm:$0xff] }
 0x1e8   : > { %v587_v33 = vadd.f32 %v586_v32, %v463_v25  ;;  %v600_v36 = vmax.f32 %v583_v29, 0.0 }
 0x1e9   : > { %v601_v35 = vmax.f32 %v585_v31, 0.0 }
 0x1ea   : > { %v602_v37 = vmax.f32 %v587_v33, 0.0 }
 0x1eb   : > { %v607_v38 = vpack.c.bf16 %v601_v35, %v599_v34 }
 0x1ec   : > { %v608_v39 = vpack.c.bf16 %v602_v37, %v600_v36  ;;  %v590_v40 = vpop.f32.mrb[4].mxu1 }
 0x1ed   : > { %v591_v41 = vadd.f32 %v590_v40, %v459_v24  ;;  %v592_v42 = vpop.f32.mrb[5].mxu1 }
 0x1ee   : > { %v593_v43 = vadd.f32 %v592_v42, %v463_v25  ;;  %v594_v44 = vpop.f32.mrb[6].mxu1  ;;  %847 = vmatprep.mubr.bf16.mxu0 %v608_v39 }
 0x1ef   : > { %v595_v45 = vadd.f32 %v594_v44, %v459_v24  ;;  %v596_v46 = vpop.f32.mrb[7].mxu1  ;;  %848 = vmatmul.mubr.bf16.vlgmr.msra.gmra.mrb[4].mxu0 %v607_v38  ;;  %v603_v48 = vmax.f32 %v591_v41, 0.0 }
 0x1f0   : > { %v597_v47 = vadd.f32 %v596_v46, %v463_v25  ;;  %v604_v50 = vmax.f32 %v593_v43, 0.0 }
 0x1f1   : > { %v605_v49 = vmax.f32 %v595_v45, 0.0 }
 0x1f2   : > { %v606_v51 = vmax.f32 %v597_v47, 0.0 }
 0x1f3   : > { %v609_v52 = vpack.c.bf16 %v605_v49, %v603_v48 }
 0x1f4   : > { %v610_v53 = vpack.c.bf16 %v606_v51, %v604_v50 }
 0x1f6   : > { %857 = vmatprep.mubr.bf16.mxu0 %v610_v53 }
 0x1f7   : > { %858 = vmatmul.mubr.bf16.gmra.mrb[8].mxu0 %v609_v52 }
 0x2c2   : > { %v849_v62 = vpop.f32.mrb[4].mxu0 }
 0x2c3   : > { %v850_v63 = vadd.f32 %v849_v62, %v648_v60  ;;  %v851_v0 = vpop.f32.mrb[5].mxu0 }
 0x2c4   : > { %v852_v1 = vadd.f32 %v851_v0, %v652_v61  ;;  %v853_v2 = vpop.f32.mrb[6].mxu0 }
 0x2c5   : > { %v854_v3 = vadd.f32 %v853_v2, %v648_v60  ;;  %v855_v4 = vpop.f32.mrb[7].mxu0  ;;  %v868_v6 = vmax.f32 %v850_v63, 0.0 }
 0x2c6   : > { %v856_v5 = vadd.f32 %v855_v4, %v652_v61  ;;  %v869_v8 = vmax.f32 %v852_v1, 0.0 }
 0x2c7   : > { %v870_v7 = vmax.f32 %v854_v3, 0.0 }
 0x2c8   : > { %v871_v9 = vmax.f32 %v856_v5, 0.0 }
 0x2c9   : > { %v876_v10 = vpack.c.bf16 %v870_v7, %v868_v6 }
 0x2ca   : > { %v877_v11 = vpack.c.bf16 %v871_v9, %v869_v8  ;;  %v859_v12 = vpop.f32.mrb[8].mxu0 }
 0x2cb   : > { %v860_v13 = vadd.f32 %v859_v12, %v648_v60  ;;  %v861_v14 = vpop.f32.mrb[9].mxu0 }
 0x2cc   : > { %v862_v15 = vadd.f32 %v861_v14, %v652_v61  ;;  %v863_v16 = vpop.f32.mrb[10].mxu0  ;;  %1047 = vmatprep.mubr.bf16.mxu1 %v877_v11 }
 0x2cd   : > { %v864_v17 = vadd.f32 %v863_v16, %v648_v60  ;;  %v865_v18 = vpop.f32.mrb[11].mxu0  ;;  %1048 = vmatmul.mubr.bf16.vlgmr.msra.gmra.mrb[8].mxu1 %v876_v10  ;;  %v872_v20 = vmax.f32 %v860_v13, 0.0 }
 0x2ce   : > { %v866_v19 = vadd.f32 %v865_v18, %v652_v61  ;;  %v873_v22 = vmax.f32 %v862_v15, 0.0 }
 0x2cf   : > { %v874_v21 = vmax.f32 %v864_v17, 0.0 }
 0x2d0   : > { %v875_v23 = vmax.f32 %v866_v19, 0.0 }
 0x2d1   : > { %v878_v24 = vpack.c.bf16 %v874_v21, %v872_v20 }
 0x2d2   : > { %v879_v25 = vpack.c.bf16 %v875_v23, %v873_v22 }
 0x2d4   : > { %1055 = vmatprep.mubr.bf16.mxu1 %v879_v25 }
 0x2d5   : > { %1056 = vmatmul.mubr.bf16.gmra.mrb[12].mxu1 %v878_v24 }
 0x3a0   : > { %v1238_v26 = vpop.f32.mrb[8].mxu1 }
 0x3a1   : > { %v1239_v28 = vpop.f32.mrb[9].mxu1 }
 0x3a2   : > { %v1240_v29 = vadd.f32 %v1239_v28, %v1238_v26  ;;  %v1241_v30 = vpop.f32.mrb[10].mxu1 }
 0x3a3   : > { %v1242_v31 = vpop.f32.mrb[11].mxu1 }
 0x3a4   : > { %v1050_v32 = vadd.f32 %v1240_v29, %v1200_v27  ;;  %v1243_v33 = vadd.f32 %v1242_v31, %v1241_v30 }
 0x3a6   : > { %1065 = vst.msk [vmem:[%s349_s17] sm:$0xff] %vm1064_vm2, %v1050_v32  ;;  %v1053_v34 = vadd.f32 %v1243_v33, %v1200_v27 }
 0x3a8   : > { %1066 = vst.msk [vmem:[%s349_s17 + $0x8] sm:$0xff] %vm1064_vm2, %v1053_v34  ;;  %v1244_v35 = vpop.f32.mrb[12].mxu1 }
 0x3a9   : > { %v1245_v36 = vpop.f32.mrb[13].mxu1 }
 0x3aa   : > { %v1246_v37 = vadd.f32 %v1245_v36, %v1244_v35  ;;  %v1247_v38 = vpop.f32.mrb[14].mxu1 }
 0x3ab   : > { %v1248_v39 = vpop.f32.mrb[15].mxu1 }
 0x3ac   : > { %v1058_v40 = vadd.f32 %v1246_v37, %v1200_v27  ;;  %v1249_v41 = vadd.f32 %v1248_v39, %v1247_v38 }
 0x3ae   : > { %1067 = vst.msk [vmem:[%s349_s17 + $0x10] sm:$0xff] %vm1064_vm2, %v1058_v40  ;;  %v1061_v42 = vadd.f32 %v1249_v41, %v1200_v27 }
 0x3b0   : > { %1068 = vst.msk [vmem:[%s349_s17 + $0x18] sm:$0xff] %vm1064_vm2, %v1061_v42 }
 0x3b1 PF: > { %s20_s30 = sadd.s32 1, %s1406_s30  }
 0x3b2   : > { %p17_p3 = scmp.ge.s32.totalorder %s20_s30, 4  }
 0x3b4   :  { %19 = sbr.rel (!%p17_p3) target bundleno = 1 (0x1), region = 91 }
 0x3bb   :  { %1091 = vsyncpa [#allocation3], 1 }
 0x3bc   :  { %1093 = vsyncpa [#allocation3 + $0x1], 1 }

</bundles_post_ra>
